<compile_context>
chip_gen: v6e
topology: v6e:2x2x1
jax: 0.10.0
libtpu: 0.0.40
codegen_flags: <defaults>
</compile_context>

<pallas_src>
import jax
import jax.numpy as jnp
from jax.experimental import pallas as pl
from jax.experimental.pallas import tpu as pltpu


def _round_up(x, m):
    return ((x + m - 1) // m) * m


# ---------------------------------------------------------------------------
# Kernel
# ---------------------------------------------------------------------------
def _goal_heads_kernel(x_ref, m_ref, w1_ref, b1_ref, w2_ref, b2_ref, out_ref):
    # x streamed as bf16; upcast right after load so VPU math is f32 (v5e-safe).
    x = x_ref[...].astype(jnp.float32)                      # (TM, D)

    # Fused layer 1: [prob|point] hidden in one MXU push.
    h = jnp.dot(x, w1_ref[...], preferred_element_type=jnp.float32) + b1_ref[...]
    h = jnp.maximum(h, 0.0)                                  # (TM, 2H)

    # Fused layer 2 against a block-diagonal weight -> (TM, 3K) = [prob | point]
    out = jnp.dot(h, w2_ref[...], preferred_element_type=jnp.float32) + b2_ref[...]

    # Masked-scatter semantics: rows with prompt_mask == False stay zero.
    mask = jnp.where(m_ref[...], 1.0, 0.0)                   # (TM, 1) f32
    out_ref[...] = out * mask


# ---------------------------------------------------------------------------
# Wrapper
# ---------------------------------------------------------------------------
def decoder_goal_pred(scene_emb, prompt_mask, fused_params, K, *, tile_m=512):
    """scene_emb: [B, N, D] f32, prompt_mask: [B, N] bool.
    Returns (goal_prob [B, N, K], goal_point [B, N, K, 2])."""
    B, N, D = scene_emb.shape
    H = D // 2
    M = B * N

    w1, b1, w2, b2 = fused_params   # (D,2H), (1,2H), (2H,3K), (1,3K)  f32

    # bf16 storage for the dominant x stream (upcast-on-load in the kernel).
    x = scene_emb.reshape(M, D).astype(jnp.bfloat16)
    m = prompt_mask.reshape(M, 1)                            # bool, 1 B/row

    # Large tiles to amortize per-grid-step overhead; no divisibility assert.
    tile_m = _round_up(max(int(tile_m), 1), 32)              # safe for bf16/bool packing
    tile_m = min(tile_m, _round_up(M, 16))                   # don't over-pad tiny inputs
    M_pad = _round_up(M, tile_m)
    if M_pad != M:
        x = jnp.pad(x, ((0, M_pad - M), (0, 0)))
        m = jnp.pad(m, ((0, M_pad - M), (0, 0)))             # pad rows -> mask False -> 0

    grid = (M_pad // tile_m,)

    flops = 2 * M_pad * (D * 2 * H + 2 * H * 3 * K)
    bytes_accessed = (M_pad * D * 2                          # bf16 x stream
                      + M_pad * 1                            # bool mask stream
                      + M_pad * 3 * K * 4                    # fused f32 output
                      + (D * 2 * H + 2 * H + 2 * H * 3 * K + 3 * K) * 4)  # weights
    cost = pl.CostEstimate(flops=flops, transcendentals=0,
                           bytes_accessed=bytes_accessed)

    out_flat = pl.pallas_call(
        _goal_heads_kernel,
        out_shape=jax.ShapeDtypeStruct((M_pad, 3 * K), jnp.float32),
        grid_spec=pl.GridSpec(
            grid=grid,
            in_specs=[
                pl.BlockSpec((tile_m, D), lambda i: (i, 0)),      # x rows (bf16)
                pl.BlockSpec((tile_m, 1), lambda i: (i, 0)),      # bool mask rows
                pl.BlockSpec((D, 2 * H), lambda i: (0, 0)),       # fused W1 (resident)
                pl.BlockSpec((1, 2 * H), lambda i: (0, 0)),       # fused b1
                pl.BlockSpec((2 * H, 3 * K), lambda i: (0, 0)),   # block-diag W2
                pl.BlockSpec((1, 3 * K), lambda i: (0, 0)),       # fused b2
            ],
            out_specs=pl.BlockSpec((tile_m, 3 * K), lambda i: (i, 0)),
        ),
        compiler_params=pltpu.CompilerParams(
            dimension_semantics=("parallel",)),
        cost_estimate=cost,
    )(x, m, w1, b1, w2, b2)

    out_flat = out_flat[:M]
    goal_prob = out_flat[:, :K].reshape(B, N, K)
    goal_point = out_flat[:, K:].reshape(B, N, K, 2)
    return goal_prob, goal_point


def decoder_forward(scene_emb, prompt_enc, fused_params, K):
    """Mirrors Decoder.forward (goal prediction branch, GOAL_PRED.ENABLE=True)."""
    result = {}
    # TODO(synk): base-class `_fusion` raises NotImplementedError; no compute to port.
    result['emd'] = None
    goal_prob, goal_point = decoder_goal_pred(
        scene_emb, prompt_enc['prompt_mask'], fused_params, K)
    result['goal_prob'] = goal_prob
    result['goal_point'] = goal_point
    return result


# ---------------------------------------------------------------------------
# Parameter construction / fusion
# ---------------------------------------------------------------------------
def init_params(key, D, K):
    """Per-head parameters in PyTorch-MLP layout (x @ W + b)."""
    H = D // 2
    ks = jax.random.split(key, 8)
    scale = 0.1
    wp1 = scale * jax.random.normal(ks[0], (D, H), jnp.float32)
    bp1 = scale * jax.random.normal(ks[1], (1, H), jnp.float32)
    wp2 = scale * jax.random.normal(ks[2], (H, K), jnp.float32)
    bp2 = scale * jax.random.normal(ks[3], (1, K), jnp.float32)
    wq1 = scale * jax.random.normal(ks[4], (D, H), jnp.float32)
    bq1 = scale * jax.random.normal(ks[5], (1, H), jnp.float32)
    wq2 = scale * jax.random.normal(ks[6], (H, 2 * K), jnp.float32)
    bq2 = scale * jax.random.normal(ks[7], (1, 2 * K), jnp.float32)
    return (wp1, bp1, wp2, bp2, wq1, bq1, wq2, bq2)


def fuse_goal_head_params(wp1, bp1, wp2, bp2, wq1, bq1, wq2, bq2):
    """Fuse both heads: one (D,2H) first layer, one block-diagonal (2H,3K) second layer."""
    D, H = wp1.shape
    K = wp2.shape[1]
    w1 = jnp.concatenate([wp1, wq1], axis=1).astype(jnp.float32)     # (D, 2H)
    b1 = jnp.concatenate([bp1, bq1], axis=1).astype(jnp.float32)     # (1, 2H)
    w2 = jnp.zeros((2 * H, 3 * K), jnp.float32)
    w2 = w2.at[:H, :K].set(wp2).at[H:, K:].set(wq2)                  # block diagonal
    b2 = jnp.concatenate([bp2, bq2], axis=1).astype(jnp.float32)     # (1, 3K)
    return (w1, b1, w2, b2)


# ---------------------------------------------------------------------------
# Pure-JAX reference (torch.zeros + masked-scatter semantics)
# ---------------------------------------------------------------------------
def _reference(scene_emb, prompt_mask, raw_params, K):
    wp1, bp1, wp2, bp2, wq1, bq1, wq2, bq2 = raw_params
    B, N, D = scene_emb.shape
    # Same bf16 quantization of the x stream as the kernel (upcast-on-load).
    x = scene_emb.reshape(-1, D).astype(jnp.bfloat16).astype(jnp.float32)
    h1 = jnp.maximum(x @ wp1 + bp1, 0.0)
    prob = h1 @ wp2 + bp2
    h2 = jnp.maximum(x @ wq1 + bq1, 0.0)
    point = h2 @ wq2 + bq2
    m = prompt_mask.reshape(-1, 1).astype(jnp.float32)
    prob = (prob * m).reshape(B, N, K)
    point = (point * m).reshape(B, N, K, 2)
    return prob, point


if __name__ == "__main__":
    B, N, D, K = 2, 8, 32, 4     # hidden_dim=32, GOAL_PRED.K=4

    key = jax.random.PRNGKey(0)
    k_x, k_m, k_p = jax.random.split(key, 3)

    scene_emb = jax.random.normal(k_x, (B, N, D), jnp.float32)
    prompt_mask = jax.random.bernoulli(k_m, 0.7, (B, N))
    raw_params = init_params(k_p, D, K)
    fused_params = fuse_goal_head_params(*raw_params)

    prompt_enc = {'prompt_emd': scene_emb, 'prompt_mask': prompt_mask}

    result = decoder_forward(scene_emb, prompt_enc, fused_params, K)
    goal_prob = jax.block_until_ready(result['goal_prob'])
    goal_point = jax.block_until_ready(result['goal_point'])

    ref_prob, ref_point = _reference(scene_emb, prompt_mask, raw_params, K)
    assert goal_prob.shape == (B, N, K)
    assert goal_point.shape == (B, N, K, 2)
    assert jnp.allclose(goal_prob, ref_prob, atol=1e-4, rtol=1e-4)
    assert jnp.allclose(goal_point, ref_point, atol=1e-4, rtol=1e-4)

    print("KERNEL_OK")
</pallas_src>

<mosaic_0001>
module attributes {stable_mosaic.version = 11 : i64} {
  func.func @_goal_heads_kernel(%arg0: i32, %arg1: memref<16x32xbf16, #tpu.memory_space<vmem>>, %arg2: memref<16x1xi32, #tpu.memory_space<vmem>>, %arg3: memref<32x32xf32, #tpu.memory_space<vmem>>, %arg4: memref<1x32xf32, #tpu.memory_space<vmem>>, %arg5: memref<32x12xf32, #tpu.memory_space<vmem>>, %arg6: memref<1x12xf32, #tpu.memory_space<vmem>>, %arg7: memref<16x12xf32, #tpu.memory_space<vmem>>) attributes {dimension_semantics = [#tpu.dimension_semantics<parallel>], iteration_bounds = array<i64: 1>, scalar_prefetch = 0 : i64, scratch_operands = 0 : i64, tpu.core_type = #tpu.core_type<tc>, window_params = [{transform_indices = @transform_0, window_bounds = array<i64: 16, 32>}, {transform_indices = @transform_1, window_bounds = array<i64: 16, 1>}, {pipeline_mode = #tpu.pipeline_mode<synchronous>, transform_indices = @transform_2, window_bounds = array<i64: 32, 32>}, {pipeline_mode = #tpu.pipeline_mode<synchronous>, transform_indices = @transform_3, window_bounds = array<i64: 1, 32>}, {pipeline_mode = #tpu.pipeline_mode<synchronous>, transform_indices = @transform_4, window_bounds = array<i64: 32, 12>}, {pipeline_mode = #tpu.pipeline_mode<synchronous>, transform_indices = @transform_5, window_bounds = array<i64: 1, 12>}, {transform_indices = @transform_6, window_bounds = array<i64: 16, 12>}]} {
    %c0 = arith.constant 0 : index
    %c0_0 = arith.constant 0 : index
    %0 = vector.load %arg1[%c0, %c0_0] : memref<16x32xbf16, #tpu.memory_space<vmem>>, vector<16x32xbf16>
    %1 = arith.extf %0 : vector<16x32xbf16> to vector<16x32xf32>
    %c0_1 = arith.constant 0 : index
    %c0_2 = arith.constant 0 : index
    %2 = vector.load %arg3[%c0_1, %c0_2] : memref<32x32xf32, #tpu.memory_space<vmem>>, vector<32x32xf32>
    %cst = arith.constant dense<0.000000e+00> : vector<16x32xf32>
    %3 = tpu.matmul %1, %2, %cst {dimension_numbers = #tpu.dot_dimension_numbers<[1], [0], [0], [1], [0, 0, 1, 1], [], []>} : vector<16x32xf32>, vector<32x32xf32>, vector<16x32xf32> -> vector<16x32xf32>
    %c0_3 = arith.constant 0 : index
    %c0_4 = arith.constant 0 : index
    %4 = vector.load %arg4[%c0_3, %c0_4] : memref<1x32xf32, #tpu.memory_space<vmem>>, vector<1x32xf32>
    %5 = vector.broadcast %4 : vector<1x32xf32> to vector<16x32xf32>
    %6 = arith.addf %3, %5 : vector<16x32xf32>
    %cst_5 = arith.constant 0.000000e+00 : f32
    %7 = vector.broadcast %cst_5 : f32 to vector<16x32xf32>
    %8 = arith.maximumf %6, %7 : vector<16x32xf32>
    %c0_6 = arith.constant 0 : index
    %c0_7 = arith.constant 0 : index
    %9 = vector.load %arg5[%c0_6, %c0_7] : memref<32x12xf32, #tpu.memory_space<vmem>>, vector<32x12xf32>
    %cst_8 = arith.constant dense<0.000000e+00> : vector<16x12xf32>
    %10 = tpu.matmul %8, %9, %cst_8 {dimension_numbers = #tpu.dot_dimension_numbers<[1], [0], [0], [1], [0, 0, 1, 1], [], []>} : vector<16x32xf32>, vector<32x12xf32>, vector<16x12xf32> -> vector<16x12xf32>
    %c0_9 = arith.constant 0 : index
    %c0_10 = arith.constant 0 : index
    %11 = vector.load %arg6[%c0_9, %c0_10] : memref<1x12xf32, #tpu.memory_space<vmem>>, vector<1x12xf32>
    %12 = vector.broadcast %11 : vector<1x12xf32> to vector<16x12xf32>
    %13 = arith.addf %10, %12 : vector<16x12xf32>
    %c0_11 = arith.constant 0 : index
    %c0_12 = arith.constant 0 : index
    %14 = vector.load %arg2[%c0_11, %c0_12] : memref<16x1xi32, #tpu.memory_space<vmem>>, vector<16x1xi32>
    %cst_13 = arith.constant dense<0> : vector<16x1xi32>
    %15 = arith.cmpi ne, %14, %cst_13 : vector<16x1xi32>
    %cst_14 = arith.constant 1.000000e+00 : f32
    %cst_15 = arith.constant 0.000000e+00 : f32
    %16 = vector.broadcast %cst_14 : f32 to vector<16x1xf32>
    %17 = vector.broadcast %cst_15 : f32 to vector<16x1xf32>
    %18 = arith.select %15, %16, %17 : vector<16x1xi1>, vector<16x1xf32>
    %19 = vector.broadcast %18 : vector<16x1xf32> to vector<16x12xf32>
    %20 = arith.mulf %13, %19 : vector<16x12xf32>
    %c0_16 = arith.constant 0 : index
    %c0_17 = arith.constant 0 : index
    %21 = vector.load %arg7[%c0_16, %c0_17] : memref<16x12xf32, #tpu.memory_space<vmem>>, vector<16x12xf32>
    tpu.vector_store %arg7[%c0_16, %c0_17], %20 {strides = array<i32>} : memref<16x12xf32, #tpu.memory_space<vmem>>, vector<16x12xf32>,
    return
  }
  func.func @transform_0(%arg0: i32) -> (i32, i32) {
    %c0_i32 = arith.constant 0 : i32
    %c0_i32_0 = arith.constant 0 : i32
    return %arg0, %c0_i32 : i32, i32
  }
  func.func @transform_1(%arg0: i32) -> (i32, i32) {
    %c0_i32 = arith.constant 0 : i32
    %c0_i32_0 = arith.constant 0 : i32
    return %arg0, %c0_i32 : i32, i32
  }
  func.func @transform_2(%arg0: i32) -> (i32, i32) {
    %c0_i32 = arith.constant 0 : i32
    %c0_i32_0 = arith.constant 0 : i32
    %c0_i32_1 = arith.constant 0 : i32
    return %c0_i32, %c0_i32_0 : i32, i32
  }
  func.func @transform_3(%arg0: i32) -> (i32, i32) {
    %c0_i32 = arith.constant 0 : i32
    %c0_i32_0 = arith.constant 0 : i32
    %c0_i32_1 = arith.constant 0 : i32
    return %c0_i32, %c0_i32_0 : i32, i32
  }
  func.func @transform_4(%arg0: i32) -> (i32, i32) {
    %c0_i32 = arith.constant 0 : i32
    %c0_i32_0 = arith.constant 0 : i32
    %c0_i32_1 = arith.constant 0 : i32
    return %c0_i32, %c0_i32_0 : i32, i32
  }
  func.func @transform_5(%arg0: i32) -> (i32, i32) {
    %c0_i32 = arith.constant 0 : i32
    %c0_i32_0 = arith.constant 0 : i32
    %c0_i32_1 = arith.constant 0 : i32
    return %c0_i32, %c0_i32_0 : i32, i32
  }
  func.func @transform_6(%arg0: i32) -> (i32, i32) {
    %c0_i32 = arith.constant 0 : i32
    %c0_i32_0 = arith.constant 0 : i32
    return %arg0, %c0_i32 : i32, i32
  }
}

</mosaic_0001>

<bundles_post_ra>
// kernel: tpu_custom_call.1
= control target key start
LH: loop header
LB: loop body
LE: loop exit
PB: predicated region body
PF: predicated region fallthrough
CT: control target
= control target key end

     0   :  { %vm39_vm0 = vcmask 261120   ;;  %s415_s0 = inlined_call_operand.vmem [shape: bf16[16,32], index: 0, kind: input, shape index: {}]   ;;  %s416_s1 = inlined_call_operand.vmem [shape: s32[16,1], index: 1, kind: input, shape index: {}]   ;;  %s417_s2 = inlined_call_operand.vmem [shape: f32[32,32], index: 2, kind: input, shape index: {}]   ;;  %s418_s3 = inlined_call_operand.vmem [shape: f32[1,32], index: 3, kind: input, shape index: {}]   ;;  %s419_s4 = inlined_call_operand.vmem [shape: f32[32,12], index: 4, kind: input, shape index: {}]   ;;  %s420_s5 = inlined_call_operand.vmem [shape: f32[1,12], index: 5, kind: input, shape index: {}]   ;;  %s421_s6 = inlined_call_operand.hbm [shape: f32[16,12], index: 6, kind: output, shape index: {}]  }
   0x1   :  { %v31_v0 = vld [vmem:[%s417_s2 + $0x18] sm:$0xff]  ;;  %v30_v1 = vld [vmem:[%s417_s2 + $0x10] sm:$0xff]  ;;  %v259_v2 = vld [vmem:[%s415_s0] sm:$0xff]  }
   0x2   :  { %274 = vmatprep.subr.mxu0 %v31_v0 }
   0x3   :  { %11 = vsyncpa [#allocation3], 0  ;;  %275 = vmatpush3.msra.mxu0 %v31_v0  ;;  %v29_v3 = vld [vmem:[%s417_s2 + $0x8] sm:$0xff]  ;;  %v260_v4 = vunpack.c.l.bf16 %v259_v2  ;;  %v28_v5 = vld [vmem:[%s417_s2] sm:$0xff]  ;;  %v261_v6 = vunpack.c.h.bf16 %v259_v2  ;;  %v329_v13 = vmov 0   ;;  %v330_v14 = vmov 0.0  }
   0x4   :  { %276 = vmatprep.subr.mxu0 %v30_v1  ;;  %v126_v7 = vld [vmem:[%s419_s4 + $0x18] sm:$0xff]  ;;  %v125_v8 = vld [vmem:[%s419_s4 + $0x10] sm:$0xff]  ;;  %v124_v9 = vld [vmem:[%s419_s4 + $0x8] sm:$0xff]  ;;  %301 = vset.pattern.permute.xlu0 %v329_v13  ;;  %vm233_vm3 = vcmask 97280  }
   0x5   :  { %277 = vmatpush3.msra.mxu0 %v30_v1  ;;  %282 = vmatprep.mubr.msk.f32.mxu0 %vm39_vm0, %v260_v4  ;;  %v123_v10 = vld [vmem:[%s419_s4] sm:$0xff]  ;;  %v216_v12 = vld [vmem:[%s416_s1 + $0x8] sm:$0xff] }
   0x6   :  { %278 = vmatprep.subr.mxu0 %v29_v3  ;;  %285 = vmatprep.subr.mxu1 %v126_v7  ;;  %v215_v11 = vld [vmem:[%s416_s1] sm:$0xff]  ;;  %vm218_vm2 = vcmp.ne.s32.totalorder %v216_v12, 0 }
   0x7   :  { %279 = vmatpush3.msra.mxu0 %v29_v3  ;;  %286 = vmatpush3.msra.mxu1 %v126_v7  ;;  %vm217_vm1 = vcmp.ne.s32.totalorder %v215_v11, 0  ;;  %v220_v16 = vsel %vm218_vm2, 1.0, %v330_v14  ;;  %v252_v18 = vld [vmem:[%s418_s3] ss:$0 sm:$0xff]  ;;  %s331_s3 = smov [#allocation2]  }
   0x8   :  { %280 = vmatprep.subr.mxu0 %v28_v5  ;;  %287 = vmatprep.subr.mxu1 %v125_v8  ;;  %v219_v15 = vsel %vm217_vm1, 1.0, %v330_v14  ;;  %v255_v26 = vld [vmem:[%s420_s5] ss:$0 sm:$0xff]  ;;  %s241_s19 = sshll.u32 %s331_s3, 4  ;;  %s242_s19 = int_to_ptr.vmem [resolvable:$true] %s241_s19 }
   0x9   :  { %281 = vmatpush3.msra.mxu0 %v28_v5  ;;  %288 = vmatpush3.msra.mxu1 %v125_v8  ;;  %v302_v17 = vpack.i.bf16 %v220_v16, %v219_v15  ;;  %s307_s20 = scalar_lea.vmem %s242_s19, 256  ;;  %p312_p1 = scmp.lt.s32.totalorder %s242_s19, %s242_s19 }
   0xa   :  { %283 = vmatmul.mubr.msk.f32.vlgmr.msra.gmra.mxu0 %vm39_vm0, %v261_v6  ;;  %289 = vmatprep.subr.mxu1 %v124_v9  ;;  %p308_p0 = scmp.ne.s32.totalorder %s242_s19, %s307_s20  ;;  %p313_p2 = scmp.lt.s32.totalorder %s307_s20, %s307_s20 }
   0xb   :  { %290 = vmatpush3.msra.mxu1 %v124_v9  ;;  %303 = vperm.xlu0 %301, %v302_v17  }
   0xc   :  { %291 = vmatprep.subr.mxu1 %v123_v10  ;;  %p314_p3 = por %p313_p2, %p312_p1 }
   0xd   :  { %292 = vmatpush3.msra.mxu1 %v123_v10 }
   0xe   :  { %p315_p4 = pnand %p314_p3, %p308_p0 }
  0x86   :  { %v304_v25 = vpop.permute.xlu0 %303 }
  0x87   :  { %v306_v27 = vunpack.i.h.bf16 %v304_v25  ;;  %v305_v29 = vunpack.i.l.bf16 %v304_v25 }
  0xca   :  { %v284_v19 = vpop.f32.mrf.mxu0 }
  0xcb   :  { %v118_v20 = vadd.f32 %v284_v19, %v252_v18 }
  0xcc   :  { %v112_v21 = vpop.f32.mrf.mxu0 }
  0xcd   :  { %v113_v22 = vadd.f32 %v252_v18, %v112_v21  ;;  %v122_v24 = vmax.f32 %v118_v20, 0.0 }
  0xcf   :  { %v121_v23 = vmax.f32 %v113_v22, 0.0 }
  0xd1   :  { %293 = vmatprep.mubr.msk.f32.mxu1 %vm39_vm0, %v121_v23 }
  0xd2   :  { %294 = vmatmul.mubr.msk.f32.vlgmr.msra.gmra.mxu1 %vm39_vm0, %v122_v24 }
 0x192   :  { %v295_v28 = vpop.f32.mrf.mxu1 }
 0x193   :  { %v212_v30 = vadd.f32 %v295_v28, %v255_v26 }
 0x194   :  { %v206_v31 = vpop.f32.mrf.mxu1 }
 0x195   :  { %v232_v32 = vmul.f32 %v306_v27, %v212_v30  ;;  %v207_v33 = vadd.f32 %v255_v26, %v206_v31 }
 0x197   :  { %235 = vst.msk [vmem:[#allocation2 + $0x8] sm:$0xff] %vm233_vm3, %v232_v32  ;;  %v231_v34 = vmul.f32 %v305_v29, %v207_v33 }
 0x199   :  { %234 = vst.msk [vmem:[#allocation2] sm:$0xff] %vm233_vm3, %v231_v34 }
 0x19a   :  { %318 = shalt.err (!%p315_p4)
}
 0x19b   :  { %s332_s5 = smov 128   ;;  %s333_s21 = smov 8  }
 0x19c   :  { %247 = dma.vmem_to_hbm [thread:$0]  %s242_s19, 256, %s421_s6, [#allocation3], %s332_s5, %s332_s5, %s333_s21  }
 0x19d   :  { %327 = dma.done.wait [#allocation3], 256  }
 0x19e   :  { %328 = vsyncadd [#allocation3], 4294967040 }
 0x19f   :  { %251 = vsyncpa [#allocation3], 1 }

</bundles_post_ra>
